<compile_context>
chip_gen: v7x
topology: tpu7x:2x2x1
jax: 0.10.0
libtpu: 0.0.40
codegen_flags: <defaults>
</compile_context>

<pallas_src>
import functools

import jax
import jax.numpy as jnp
from jax.experimental import pallas as pl
from jax.experimental.pallas import tpu as pltpu

S_PAD = 16              # padded state width (n_states + 1 bias lane + zeros), bf16-tile aligned
H_PAD = 128             # padded hidden / head-output width (lane-friendly)
HIDDEN = 64             # logical hidden width from the spec
BIAS_COL = HIDDEN       # hidden lane carrying a constant 1 (bias fold)
SLAB_ROWS = S_PAD + 2 * H_PAD   # 272


# ---------------------------------------------------------------------------
# Pallas kernel: 3 bf16 matmuls (fc1, fc2, fused dueling head) + ReLUs +
# a single lane-broadcast dueling combine.  Biases ride inside the matmuls.
# ---------------------------------------------------------------------------
def dqn_kernel(s_ref, slab_ref, q_ref, *, n_actions):
    # Static slab layout (bf16, 16-row aligned regions):
    #   rows [0, 16)    : W1_aug  (S_PAD,  H_PAD)   b1 in row n_states, 1.0 at [n_states, 64]
    #   rows [16, 144)  : W2_aug  (H_PAD,  H_PAD)   b2 in row 64,       1.0 at [64, 64]
    #   rows [144, 272) : W_head  (H_PAD,  H_PAD)   [a cols | (v - mean a) col], biases in row 64
    w1 = slab_ref[0:S_PAD, :]
    w2 = slab_ref[S_PAD:S_PAD + H_PAD, :]
    wh = slab_ref[S_PAD + H_PAD:S_PAD + 2 * H_PAD, :]

    s = s_ref[...].astype(jnp.bfloat16)                       # (Bt, S_PAD), lane n_states == 1

    # fc: Linear+ReLU, Linear+ReLU.  Bias lane 64 carries 1.0 through both layers.
    h1 = jnp.maximum(jnp.dot(s, w1, preferred_element_type=jnp.float32), 0.0)
    h2 = jnp.maximum(
        jnp.dot(h1.astype(jnp.bfloat16), w2, preferred_element_type=jnp.float32), 0.0)

    # Fused head: columns [0:n_actions] = a, column n_actions = v - mean(a).
    head = jnp.dot(h2.astype(jnp.bfloat16), wh, preferred_element_type=jnp.float32)

    diff = head[:, n_actions:n_actions + 1]                   # (Bt, 1) == v - mean(a)
    # q = a + (v - mean(a)); computed lane-dense over the padded block, only the
    # first n_actions lanes are meaningful (sliced in the wrapper).
    q_ref[...] = (head + diff).astype(q_ref.dtype)


def _augment_states(s):
    """Pad states to S_PAD lanes with a constant-1 bias lane at lane n_states."""
    B, n_states = s.shape
    ones = jnp.ones((B, 1), jnp.float32)
    zeros = jnp.zeros((B, S_PAD - n_states - 1), jnp.float32)
    return jnp.concatenate([s.astype(jnp.float32), ones, zeros], axis=-1)


def dqn_forward(s, slab, *, n_actions, block_b=512):
    B = s.shape[0]
    s_aug = _augment_states(s)

    bt = B if B <= block_b else block_b
    assert B % bt == 0 and bt % 8 == 0, "batch must be a multiple of 8 (and of the batch tile)"

    grid_spec = pltpu.PrefetchScalarGridSpec(
        num_scalar_prefetch=0,
        grid=(B // bt,),
        in_specs=[
            pl.BlockSpec((bt, S_PAD), lambda i: (i, 0)),            # batch tile of states
            pl.BlockSpec((SLAB_ROWS, H_PAD), lambda i: (0, 0)),     # resident weight slab
        ],
        out_specs=pl.BlockSpec((bt, H_PAD), lambda i: (i, 0)),
    )
    q_pad = pl.pallas_call(
        functools.partial(dqn_kernel, n_actions=n_actions),
        out_shape=jax.ShapeDtypeStruct((B, H_PAD), jnp.float32),
        grid_spec=grid_spec,
        compiler_params=pltpu.CompilerParams(dimension_semantics=("parallel",)),
    )(s_aug, slab)
    return q_pad[:, :n_actions]


# ---------------------------------------------------------------------------
# Deterministic parameter setup (glue, plain JAX).
# NoisyLinear effective weights: W = W_mu + W_sigma * (eps_out ⊗ eps_in),
# factorized Gaussian noise folded into fixed weights for this deterministic run.
# ---------------------------------------------------------------------------
def _f_noise(x):
    return jnp.sign(x) * jnp.sqrt(jnp.abs(x))


def noisy_linear_params(key, n_in, n_out, sigma0=0.5):
    k1, k2, k3, k4 = jax.random.split(key, 4)
    bound = 1.0 / jnp.sqrt(jnp.float32(n_in))
    w_mu = jax.random.uniform(k1, (n_in, n_out), jnp.float32, -bound, bound)
    b_mu = jax.random.uniform(k2, (1, n_out), jnp.float32, -bound, bound)
    w_sigma = jnp.full((n_in, n_out), sigma0 / jnp.sqrt(jnp.float32(n_in)), jnp.float32)
    b_sigma = jnp.full((1, n_out), sigma0 / jnp.sqrt(jnp.float32(n_in)), jnp.float32)
    eps_in = _f_noise(jax.random.normal(k3, (n_in, 1), jnp.float32))
    eps_out = _f_noise(jax.random.normal(k4, (1, n_out), jnp.float32))
    w = w_mu + w_sigma * (eps_in * eps_out)
    b = b_mu + b_sigma * eps_out
    return w, b


def make_raw_params(key, n_states, n_actions, hidden=HIDDEN):
    k1, k2, k3, k4 = jax.random.split(key, 4)
    w1, b1 = noisy_linear_params(k1, n_states, hidden)
    w2, b2 = noisy_linear_params(k2, hidden, hidden)
    wa, ba = noisy_linear_params(k3, hidden, n_actions)
    wv, bv = noisy_linear_params(k4, hidden, 1)
    return {"w1": w1, "b1": b1, "w2": w2, "b2": b2,
            "wa": wa, "ba": ba, "wv": wv, "bv": bv}


def pack_params(raw, *, n_states, n_actions, hidden=HIDDEN):
    """Fold biases + dueling combine into the weights; pack into one bf16 slab."""
    w1, b1 = raw["w1"], raw["b1"]
    w2, b2 = raw["w2"], raw["b2"]
    wa, ba = raw["wa"], raw["ba"]
    wv, bv = raw["wv"], raw["bv"]

    # fc1: b1 folded via the constant-1 state lane; route a 1 into hidden lane BIAS_COL.
    W1 = jnp.zeros((S_PAD, H_PAD), jnp.float32)
    W1 = W1.at[:n_states, :hidden].set(w1)
    W1 = W1.at[n_states, :hidden].set(b1[0])
    W1 = W1.at[n_states, BIAS_COL].set(1.0)

    # fc2: b2 folded via hidden lane BIAS_COL; keep the constant 1 alive.
    W2 = jnp.zeros((H_PAD, H_PAD), jnp.float32)
    W2 = W2.at[:hidden, :hidden].set(w2)
    W2 = W2.at[BIAS_COL, :hidden].set(b2[0])
    W2 = W2.at[BIAS_COL, BIAS_COL].set(1.0)

    # Fused dueling head: a columns + one (v - mean(a)) column; biases in row BIAS_COL.
    WH = jnp.zeros((H_PAD, H_PAD), jnp.float32)
    WH = WH.at[:hidden, :n_actions].set(wa)
    WH = WH.at[:hidden, n_actions].set((wv - jnp.mean(wa, axis=1, keepdims=True))[:, 0])
    WH = WH.at[BIAS_COL, :n_actions].set(ba[0])
    WH = WH.at[BIAS_COL, n_actions].set((bv - jnp.mean(ba))[0, 0])

    slab = jnp.concatenate([W1, W2, WH], axis=0)              # (272, 128)
    return slab.astype(jnp.bfloat16)


if __name__ == "__main__":
    # CartPole-like config: n_states=4, n_actions=2; small batch.
    B, n_states, n_actions = 8, 4, 2
    key = jax.random.PRNGKey(0)
    k_params, k_input = jax.random.split(key)

    raw = make_raw_params(k_params, n_states, n_actions)
    slab = pack_params(raw, n_states=n_states, n_actions=n_actions)
    s = jax.random.normal(k_input, (B, n_states), jnp.float32)

    q = dqn_forward(s, slab, n_actions=n_actions)
    q = jax.block_until_ready(q)

    # Pure-JAX f32 reference (original, un-fused math).  Tolerance loosened for
    # the bf16 weight/activation cast inside the kernel.
    h1 = jnp.maximum(s @ raw["w1"] + raw["b1"], 0.0)
    h2 = jnp.maximum(h1 @ raw["w2"] + raw["b2"], 0.0)
    a = h2 @ raw["wa"] + raw["ba"]
    v = h2 @ raw["wv"] + raw["bv"]
    q_ref = v + (a - jnp.mean(a, axis=-1, keepdims=True))
    assert q.shape == (B, n_actions)
    assert jnp.allclose(q, q_ref, atol=5e-2, rtol=5e-2), (q, q_ref)

    print("KERNEL_OK")
</pallas_src>

<mosaic_0001>
module attributes {stable_mosaic.version = 11 : i64} {
  func.func @dqn_kernel(%arg0: i32, %arg1: memref<8x16xf32, #tpu.memory_space<vmem>>, %arg2: memref<272x128xbf16, #tpu.memory_space<vmem>>, %arg3: memref<8x128xf32, #tpu.memory_space<vmem>>) attributes {dimension_semantics = [#tpu.dimension_semantics<parallel>], iteration_bounds = array<i64: 1>, scalar_prefetch = 0 : i64, scratch_operands = 0 : i64, tpu.core_type = #tpu.core_type<tc>, window_params = [{transform_indices = @transform_0, window_bounds = array<i64: 8, 16>}, {pipeline_mode = #tpu.pipeline_mode<synchronous>, transform_indices = @transform_1, window_bounds = array<i64: 272, 128>}, {transform_indices = @transform_2, window_bounds = array<i64: 8, 128>}]} {
    %c0 = arith.constant 0 : index
    %c0_0 = arith.constant 0 : index
    %0 = vector.load %arg2[%c0, %c0_0] : memref<272x128xbf16, #tpu.memory_space<vmem>>, vector<16x128xbf16>
    %c16 = arith.constant 16 : index
    %c0_1 = arith.constant 0 : index
    %1 = vector.load %arg2[%c16, %c0_1] : memref<272x128xbf16, #tpu.memory_space<vmem>>, vector<128x128xbf16>
    %c144 = arith.constant 144 : index
    %c0_2 = arith.constant 0 : index
    %2 = vector.load %arg2[%c144, %c0_2] : memref<272x128xbf16, #tpu.memory_space<vmem>>, vector<128x128xbf16>
    %c0_3 = arith.constant 0 : index
    %c0_4 = arith.constant 0 : index
    %3 = vector.load %arg1[%c0_3, %c0_4] : memref<8x16xf32, #tpu.memory_space<vmem>>, vector<8x16xf32>
    %4 = arith.truncf %3 : vector<8x16xf32> to vector<8x16xbf16>
    %cst = arith.constant dense<0.000000e+00> : vector<8x128xf32>
    %5 = tpu.matmul %4, %0, %cst {dimension_numbers = #tpu.dot_dimension_numbers<[1], [0], [0], [1], [0, 0, 1, 1], [], []>} : vector<8x16xbf16>, vector<16x128xbf16>, vector<8x128xf32> -> vector<8x128xf32>
    %cst_5 = arith.constant 0.000000e+00 : f32
    %6 = vector.broadcast %cst_5 : f32 to vector<8x128xf32>
    %7 = arith.maximumf %5, %6 : vector<8x128xf32>
    %8 = arith.truncf %7 : vector<8x128xf32> to vector<8x128xbf16>
    %cst_6 = arith.constant dense<0.000000e+00> : vector<8x128xf32>
    %9 = tpu.matmul %8, %1, %cst_6 {dimension_numbers = #tpu.dot_dimension_numbers<[1], [0], [0], [1], [0, 0, 1, 1], [], []>} : vector<8x128xbf16>, vector<128x128xbf16>, vector<8x128xf32> -> vector<8x128xf32>
    %cst_7 = arith.constant 0.000000e+00 : f32
    %10 = vector.broadcast %cst_7 : f32 to vector<8x128xf32>
    %11 = arith.maximumf %9, %10 : vector<8x128xf32>
    %12 = arith.truncf %11 : vector<8x128xf32> to vector<8x128xbf16>
    %cst_8 = arith.constant dense<0.000000e+00> : vector<8x128xf32>
    %13 = tpu.matmul %12, %2, %cst_8 {dimension_numbers = #tpu.dot_dimension_numbers<[1], [0], [0], [1], [0, 0, 1, 1], [], []>} : vector<8x128xbf16>, vector<128x128xbf16>, vector<8x128xf32> -> vector<8x128xf32>
    %14 = vector.extract_strided_slice %13 {offsets = [0, 2], sizes = [8, 1], strides = [1, 1]} : vector<8x128xf32> to vector<8x1xf32>
    %15 = vector.broadcast %14 : vector<8x1xf32> to vector<8x128xf32>
    %16 = arith.addf %13, %15 : vector<8x128xf32>
    %c0_9 = arith.constant 0 : index
    %c0_10 = arith.constant 0 : index
    %17 = vector.load %arg3[%c0_9, %c0_10] : memref<8x128xf32, #tpu.memory_space<vmem>>, vector<8x128xf32>
    tpu.vector_store %arg3[%c0_9, %c0_10], %16 {strides = array<i32>} : memref<8x128xf32, #tpu.memory_space<vmem>>, vector<8x128xf32>,
    return
  }
  func.func @transform_0(%arg0: i32) -> (i32, i32) {
    %c0_i32 = arith.constant 0 : i32
    %c0_i32_0 = arith.constant 0 : i32
    return %arg0, %c0_i32 : i32, i32
  }
  func.func @transform_1(%arg0: i32) -> (i32, i32) {
    %c0_i32 = arith.constant 0 : i32
    %c0_i32_0 = arith.constant 0 : i32
    %c0_i32_1 = arith.constant 0 : i32
    return %c0_i32, %c0_i32_0 : i32, i32
  }
  func.func @transform_2(%arg0: i32) -> (i32, i32) {
    %c0_i32 = arith.constant 0 : i32
    %c0_i32_0 = arith.constant 0 : i32
    return %arg0, %c0_i32 : i32, i32
  }
}

</mosaic_0001>

<bundles_post_ra>
// kernel: tpu_custom_call.1
= control target key start
LH: loop header
LB: loop body
LE: loop exit
PB: predicated region body
PF: predicated region fallthrough
CT: control target
= control target key end

     0   :  { %7 = vsyncpa [#allocation3], 0  ;;  %s576_s0 = inlined_call_operand.hbm [shape: f32[8,16], index: 0, kind: input, shape index: {}]   ;;  %s577_s1 = inlined_call_operand.hbm [shape: bf16[272,128], index: 1, kind: input, shape index: {}]   ;;  %s578_s2 = inlined_call_operand.hbm [shape: f32[8,128], index: 2, kind: output, shape index: {}]  }
   0x1   :  { %8 = vsyncpa [#allocation6], 0 }
   0x2   :  { %9 = vsyncpa [#allocation4], 0  ;;  %s510_s9 = smov [#allocation2]   ;;  %s511_s11 = smov [#allocation5]  }
   0x3   :  { %s16_s10 = sshll.u32 %s510_s9, 4  ;;  %s25_s12 = sshll.u32 %s511_s11, 4  ;;  %s17_s10 = int_to_ptr.vmem [resolvable:$true] %s16_s10  ;;  %s533_s12 = int_to_ptr.vmem [resolvable:$true] %s25_s12 }
   0x4   :  { %s438_s15 = scalar_lea.hbm %s576_s0, 128 }
   0x5   :  { %p439_p0 = scmp.ne.s32.totalorder %s576_s0, %s438_s15  ;;  %p442_p1 = scmp.lt.u32.totalorder %s438_s15, %s576_s0 }
   0x7   :  { %p444_p2 = pnand %p442_p1, %p439_p0 }
   0x9   :  { %447 = shalt.err (!%p444_p2)
}
   0xa   :  { %s448_s20 = scalar_lea.vmem %s17_s10, 128  ;;  %p453_p4 = scmp.lt.s32.totalorder %s17_s10, %s17_s10 }
   0xb   :  { %p449_p3 = scmp.ne.s32.totalorder %s17_s10, %s448_s20  ;;  %p454_p5 = scmp.lt.s32.totalorder %s448_s20, %s448_s20 }
   0xd   :  { %p455_p6 = por %p454_p5, %p453_p4 }
   0xf   :  { %p456_p7 = pnand %p455_p6, %p449_p3 }
  0x11   :  { %459 = shalt.err (!%p456_p7)
}
  0x12   :  { %19 = dma.hbm_to_vmem [thread:$0]  %s576_s0, 128, %s17_s10, [#allocation3]  }
  0x13   :  { %s460_s25 = scalar_lea.hbm %s577_s1, 2176 }
  0x14   :  { %p461_p8 = scmp.ne.s32.totalorder %s577_s1, %s460_s25  ;;  %p464_p9 = scmp.lt.u32.totalorder %s460_s25, %s577_s1 }
  0x16   :  { %p466_p10 = pnand %p464_p9, %p461_p8 }
  0x18   :  { %469 = shalt.err (!%p466_p10)
}
  0x19   :  { %s470_s30 = scalar_lea.vmem %s533_s12, 2176  ;;  %p475_p12 = scmp.lt.s32.totalorder %s533_s12, %s533_s12 }
  0x1a   :  { %p471_p11 = scmp.ne.s32.totalorder %s533_s12, %s470_s30  ;;  %p476_p13 = scmp.lt.s32.totalorder %s470_s30, %s470_s30 }
  0x1c   :  { %p477_p0 = por %p476_p13, %p475_p12 }
  0x1e   :  { %p478_p1 = pnand %p477_p0, %p471_p11 }
  0x20   :  { %481 = shalt.err (!%p478_p1)
}
  0x21   :  { %s512_s0 = smov 64   ;;  %s513_s3 = smov 4  }
  0x22   :  { %31 = dma.hbm_to_vmem [thread:$0]  %s577_s1, 2176, %s533_s12, [#allocation6], %s512_s0, %s512_s0, %s513_s3  }
  0x23   :  { %504 = dma.done.wait [#allocation3], 128  }
  0x24   :  { %505 = vsyncadd [#allocation3], 4294967168 }
  0x25   :  { %506 = dma.done.wait [#allocation6], 2176  }
  0x26   :  { %507 = vsyncadd [#allocation6], 4294965120  ;;  %v514_v0 = vmov 0.0   ;;  %vm515_vm0 = vmmov 0   ;;  %v421_v1 = vld [vmem:[#allocation5] sm:$0xff]   ;;  %v73_v2 = vld [vmem:[#allocation2] sm:$0xff] }
  0x27   :  { %366 = vmatprep.subr.bf16.mxu0 %v514_v0  ;;  %368 = vmatprep.mubr.msk.bf16.mxu0 %vm515_vm0, %v514_v0  ;;  %v74_v3 = vpack.c.bf16 %v73_v2, %v73_v2  ;;  %vm81_vm1 = vcmask 130048   ;;  %v422_v4 = vld [vmem:[#allocation5 + $0x8] sm:$0xff]   ;;  %v423_v5 = vld [vmem:[#allocation5 + $0x10] sm:$0xff]   ;;  %v424_v6 = vld [vmem:[#allocation5 + $0x18] sm:$0xff]   ;;  %v516_v26 = vmov 2   ;;  %s517_s1 = smov [#allocation7]  }
  0x28   :  { %372 = vmatprep.subr.bf16.mxu1 %v514_v0  ;;  %388 = vmatprep.mubr.msk.bf16.mxu1 %vm515_vm0, %v514_v0  ;;  %v425_v7 = vld [vmem:[#allocation5 + $0x20] sm:$0xff]   ;;  %v426_v8 = vld [vmem:[#allocation5 + $0x28] sm:$0xff]   ;;  %v427_v9 = vld [vmem:[#allocation5 + $0x30] sm:$0xff]   ;;  %s318_s6 = sshll.u32 %s517_s1, 4  ;;  %s319_s6 = int_to_ptr.vmem [resolvable:$true] %s318_s6 }
  0x29   :  { %367 = vmatpush3.bf16.msra.mxu0 %v421_v1  ;;  %373 = vmatpush3.bf16.msra.mxu1 %v422_v4  ;;  %v428_v10 = vld [vmem:[#allocation5 + $0x38] sm:$0xff]   ;;  %v429_v11 = vld [vmem:[#allocation5 + $0x40] sm:$0xff]   ;;  %v430_v12 = vld [vmem:[#allocation5 + $0x48] sm:$0xff]   ;;  %s482_s7 = scalar_lea.vmem %s319_s6, 128  ;;  %p487_p3 = scmp.lt.s32.totalorder %s319_s6, %s319_s6 }
  0x2a   :  { %392 = vmatprep.subr.bf16.mxu0 %v514_v0  ;;  %374 = vmatprep.subr.bf16.mxu1 %v514_v0  ;;  %v431_v13 = vld [vmem:[#allocation5 + $0x50] sm:$0xff]   ;;  %v432_v14 = vld [vmem:[#allocation5 + $0x58] sm:$0xff]   ;;  %v433_v15 = vld [vmem:[#allocation5 + $0x60] sm:$0xff]   ;;  %p483_p2 = scmp.ne.s32.totalorder %s319_s6, %s482_s7  ;;  %p488_p4 = scmp.lt.s32.totalorder %s482_s7, %s482_s7 }
  0x2b   :  { %v434_v16 = vld [vmem:[#allocation5 + $0x68] sm:$0xff]   ;;  %v435_v17 = vld [vmem:[#allocation5 + $0x70] sm:$0xff]   ;;  %v436_v18 = vld [vmem:[#allocation5 + $0x78] sm:$0xff]   ;;  %420 = vset.pattern.permute.xlu0 %v516_v26 }
  0x2c   :  { %369 = vmatmul.mubr.msk.bf16.vlgmr.msra.gmra.mrb[0].mxu0 %vm81_vm1, %v74_v3  ;;  %v437_v25 = vld [vmem:[#allocation5 + $0x80] sm:$0xff]   ;;  %p489_p5 = por %p488_p4, %p487_p3 }
  0x2d   :  { %408 = vmatprep.mubr.msk.bf16.mxu0 %vm515_vm0, %v514_v0  ;;  %375 = vmatpush3.bf16.msra.mxu1 %v423_v5 }
  0x2e   :  { %376 = vmatprep.subr.bf16.mxu1 %v514_v0  ;;  %393 = vmatpush3.bf16.msra.mxu0 %v430_v12  ;;  %p490_p6 = pnand %p489_p5, %p483_p2 }
  0x2f   :  { %394 = vmatprep.subr.bf16.mxu0 %v514_v0 }
  0x31   :  { %377 = vmatpush3.bf16.msra.mxu1 %v424_v6 }
  0x32   :  { %378 = vmatprep.subr.bf16.mxu1 %v514_v0  ;;  %395 = vmatpush3.bf16.msra.mxu0 %v431_v13 }
  0x33   :  { %396 = vmatprep.subr.bf16.mxu0 %v514_v0 }
  0x35   :  { %379 = vmatpush3.bf16.msra.mxu1 %v425_v7 }
  0x36   :  { %380 = vmatprep.subr.bf16.mxu1 %v514_v0  ;;  %397 = vmatpush3.bf16.msra.mxu0 %v432_v14 }
  0x37   :  { %398 = vmatprep.subr.bf16.mxu0 %v514_v0 }
  0x39   :  { %381 = vmatpush3.bf16.msra.mxu1 %v426_v8 }
  0x3a   :  { %382 = vmatprep.subr.bf16.mxu1 %v514_v0  ;;  %399 = vmatpush3.bf16.msra.mxu0 %v433_v15 }
  0x3b   :  { %400 = vmatprep.subr.bf16.mxu0 %v514_v0 }
  0x3d   :  { %383 = vmatpush3.bf16.msra.mxu1 %v427_v9 }
  0x3e   :  { %384 = vmatprep.subr.bf16.mxu1 %v514_v0  ;;  %401 = vmatpush3.bf16.msra.mxu0 %v434_v16 }
  0x3f   :  { %402 = vmatprep.subr.bf16.mxu0 %v514_v0 }
  0x41   :  { %385 = vmatpush3.bf16.msra.mxu1 %v428_v10 }
  0x42   :  { %386 = vmatprep.subr.bf16.mxu1 %v514_v0  ;;  %403 = vmatpush3.bf16.msra.mxu0 %v435_v17 }
  0x43   :  { %404 = vmatprep.subr.bf16.mxu0 %v514_v0 }
  0x45   :  { %387 = vmatpush3.bf16.msra.mxu1 %v429_v11 }
  0x46   :  { %405 = vmatpush3.bf16.msra.mxu0 %v436_v18 }
  0x47   :  { %406 = vmatprep.subr.bf16.mxu0 %v514_v0 }
  0x4a   :  { %407 = vmatpush3.bf16.msra.mxu0 %v437_v25 }
  0xff   :  { %v119_v19 = vpop.f32.mrb[0].mxu0 }
 0x100   :  { %v125_v20 = vmax.f32 %v119_v19, 0.0  ;;  %v370_v21 = vpop.f32.mrb[1].mxu0 }
 0x101   :  { %v122_v22 = vpop.f32.mrb[2].mxu0 }
 0x102   :  { %v126_v23 = vpack.c.bf16 %v125_v20, %v125_v20  ;;  %v371_v24 = vpop.f32.mrb[3].mxu0 }
 0x104   :  { %389 = vmatmul.mubr.bf16.vlgmr.msra.gmra.mrb[0].mxu1 %v126_v23 }
 0x1d7   :  { %v209_v27 = vpop.f32.mrb[0].mxu1 }
 0x1d8   :  { %v215_v28 = vmax.f32 %v209_v27, 0.0  ;;  %v390_v29 = vpop.f32.mrb[1].mxu1 }
 0x1d9   :  { %v212_v30 = vpop.f32.mrb[2].mxu1 }
 0x1da   :  { %v216_v31 = vpack.c.bf16 %v215_v28, %v215_v28  ;;  %v391_v32 = vpop.f32.mrb[3].mxu1 }
 0x1dc   :  { %409 = vmatmul.mubr.bf16.vlgmr.msra.gmra.mrb[4].mxu0 %v216_v31 }
 0x2af   :  { %v299_v33 = vpop.f32.mrb[4].mxu0 }
 0x2b0   :  { %307 = vperm.xlu0 %420, %v299_v33   ;;  %v410_v34 = vpop.f32.mrb[5].mxu0 }
 0x2b1   :  { %v302_v35 = vpop.f32.mrb[6].mxu0 }
 0x2b2   :  { %v411_v36 = vpop.f32.mrb[7].mxu0 }
 0x32f   :  { %v308_v37 = vpop.permute.xlu0 %307 }
 0x330   :  { %v310_v38 = vadd.f32 %v308_v37, %v299_v33 }
 0x332   :  { %311 = vst [vmem:[#allocation7] sm:$0xff] %v310_v38 }
 0x333   :  { %493 = shalt.err (!%p490_p6)
}
 0x334   :  { %s494_s10 = scalar_lea.hbm %s578_s2, 128 }
 0x335   :  { %p495_p7 = scmp.ne.s32.totalorder %s578_s2, %s494_s10  ;;  %p498_p8 = scmp.lt.u32.totalorder %s494_s10, %s578_s2 }
 0x337   :  { %p500_p9 = pnand %p498_p8, %p495_p7 }
 0x339   :  { %503 = shalt.err (!%p500_p9)
}
 0x33a   :  { %321 = dma.vmem_to_hbm [thread:$0]  %s319_s6, 128, %s578_s2, [#allocation4]  }
 0x33b   :  { %508 = dma.done.wait [#allocation4], 128  }
 0x33c   :  { %509 = vsyncadd [#allocation4], 4294967168 }
 0x33d   :  { %325 = vsyncpa [#allocation3], 1 }
 0x33e   :  { %326 = vsyncpa [#allocation6], 1 }
 0x33f   :  { %327 = vsyncpa [#allocation4], 1 }

</bundles_post_ra>
